<compile_context>
chip_gen: v6e
topology: v6e:2x2x1
jax: 0.10.0
libtpu: 0.0.40
codegen_flags: <defaults>
</compile_context>

<pallas_src>
import jax
import jax.numpy as jnp
from jax.experimental import pallas as pl
from jax.experimental.pallas import tpu as pltpu

BN_EPS = 1e-5


def _round_up(n, m):
    return ((n + m - 1) // m) * m


# Bias-slab row layout (static). Pre-BN linear biases are intentionally absent.
(R_G1, R_BE1, R_G2, R_BE2, R_BML, R_G3, R_BE3, R_G4, R_BE4, R_B5) = range(10)
N_BIAS_ROWS = 10


def _layout(D, H, L):
    """128-aligned packing layout shared by the kernel builder and the JAX wrapper."""
    Dp, Hp, Lp = _round_up(D, 128), _round_up(H, 128), _round_up(L, 128)
    roff = {}
    roff["w1"] = 0                    # K = Dp
    roff["w2"] = roff["w1"] + Dp      # K = Hp
    roff["wml"] = roff["w2"] + Hp     # K = Hp  (fused fc_mu | fc_logvar)
    roff["w3"] = roff["wml"] + Hp     # K = Lp
    roff["w4"] = roff["w3"] + Lp      # K = Hp
    roff["w5"] = roff["w4"] + Hp      # K = Hp
    rows = roff["w5"] + Hp
    omax = max(Hp, 2 * Lp, Dp)        # weight/bias-slab lane width (multiple of 128)
    pin = Dp + Lp                     # packed input width
    pout = Dp + 2 * Lp                # packed output width
    return Dp, Hp, Lp, roff, rows, omax, pin, pout


def _make_kernel(B, Dp, Hp, Lp, roff):
    """Build the fused forward kernel with all dims / offsets baked in as constants."""

    def kernel(xin_ref, w_ref, bias_ref, out_ref):
        xin = xin_ref[...]                    # [B, Dp+Lp] f32
        x = xin[:, :Dp]                       # [B, Dp]  (lanes >= D are zero)
        noise = xin[:, Dp:Dp + Lp]            # [B, Lp]  (lanes >= L are zero)

        def matmul(h, key, kpad, opad):
            # Full lane-dense MXU operands: bf16 inputs, f32 accumulation.
            r0 = roff[key]
            w = w_ref[r0:r0 + kpad, :opad]    # bf16 [kpad, opad], both multiples of 128
            return jnp.dot(h.astype(jnp.bfloat16), w,
                           preferred_element_type=jnp.float32)

        def bn_relu(h, g_row, be_row, width):
            # Training-mode BN (batch mean, biased var), gamma/beta folded into one
            # scale/shift FMA, then ReLU. All f32. Padded lanes (gamma=beta=0) stay 0.
            g = bias_ref[g_row:g_row + 1, :width]
            be = bias_ref[be_row:be_row + 1, :width]
            mean = jnp.mean(h, axis=0, keepdims=True)
            msq = jnp.mean(h * h, axis=0, keepdims=True)
            var = msq - mean * mean
            scale = g * jax.lax.rsqrt(var + BN_EPS)
            shift = be - mean * scale
            return jnp.maximum(h * scale + shift, 0.0)

        # ---- encoder (no pre-BN biases: they cancel under batch-mean subtraction) ----
        h = bn_relu(matmul(x, "w1", Dp, Hp), R_G1, R_BE1, Hp)
        h = bn_relu(matmul(h, "w2", Hp, Hp), R_G2, R_BE2, Hp)

        # ---- fused fc_mu | fc_logvar (one matmul; each in its own 128-aligned block) --
        ml = matmul(h, "wml", Hp, 2 * Lp) + bias_ref[R_BML:R_BML + 1, :2 * Lp]
        mu = ml[:, :Lp]                       # real values in lanes [0, L)
        logvar = ml[:, Lp:2 * Lp]             # real values in lanes [0, L)

        # ---- reparameterization: z = mu + exp(0.5*logvar) * noise (padded lanes -> 0) -
        z = mu + jnp.exp(0.5 * logvar) * noise

        # ---- decoder ----
        d = bn_relu(matmul(z, "w3", Lp, Hp), R_G3, R_BE3, Hp)
        d = bn_relu(matmul(d, "w4", Hp, Hp), R_G4, R_BE4, Hp)
        xhat = jax.nn.sigmoid(matmul(d, "w5", Hp, Dp) + bias_ref[R_B5:R_B5 + 1, :Dp])

        # ---- single full-width lane-dense store: (x_hat | mu | logvar) ----
        out_ref[...] = jnp.concatenate([xhat, mu, logvar], axis=-1)

    return kernel


def _full_spec(shape):
    nd = len(shape)
    return pl.BlockSpec(shape, lambda *_, nd=nd: (0,) * nd)


@jax.jit
def mgvae_forward(x, noise, params):
    """Returns (x_hat, mu, logvar) — same semantics as MGVAE.forward (training-mode BN)."""
    B, D = x.shape
    L = noise.shape[1]
    H = params["w1"].shape[1]

    Dp, Hp, Lp, roff, rows, Omax, Pin, Pout = _layout(D, H, L)

    # --- flat weight slab: per-layer [round128(K_i), round128(N_i)] tiles at static ---
    # --- 128-aligned row offsets; fc_mu / fc_logvar in separate column blocks.      ---
    w_slab = jnp.zeros((rows, Omax), jnp.float32)
    w_slab = w_slab.at[roff["w1"]:roff["w1"] + D, :H].set(params["w1"])
    w_slab = w_slab.at[roff["w2"]:roff["w2"] + H, :H].set(params["w2"])
    w_slab = w_slab.at[roff["wml"]:roff["wml"] + H, :L].set(params["wmu"])
    w_slab = w_slab.at[roff["wml"]:roff["wml"] + H, Lp:Lp + L].set(params["wlv"])
    w_slab = w_slab.at[roff["w3"]:roff["w3"] + L, :H].set(params["w3"])
    w_slab = w_slab.at[roff["w4"]:roff["w4"] + H, :H].set(params["w4"])
    w_slab = w_slab.at[roff["w5"]:roff["w5"] + H, :D].set(params["w5"])
    w_slab = w_slab.astype(jnp.bfloat16)                       # [rows, Omax] bf16

    # --- bias slab: BN gamma/beta + fc_mu|fc_logvar bias + decoder output bias only ---
    bias_slab = jnp.zeros((N_BIAS_ROWS, Omax), jnp.float32)
    bias_slab = bias_slab.at[R_G1, :H].set(params["g1"].reshape(-1))
    bias_slab = bias_slab.at[R_BE1, :H].set(params["be1"].reshape(-1))
    bias_slab = bias_slab.at[R_G2, :H].set(params["g2"].reshape(-1))
    bias_slab = bias_slab.at[R_BE2, :H].set(params["be2"].reshape(-1))
    bias_slab = bias_slab.at[R_BML, :L].set(params["bmu"].reshape(-1))
    bias_slab = bias_slab.at[R_BML, Lp:Lp + L].set(params["blv"].reshape(-1))
    bias_slab = bias_slab.at[R_G3, :H].set(params["g3"].reshape(-1))
    bias_slab = bias_slab.at[R_BE3, :H].set(params["be3"].reshape(-1))
    bias_slab = bias_slab.at[R_G4, :H].set(params["g4"].reshape(-1))
    bias_slab = bias_slab.at[R_BE4, :H].set(params["be4"].reshape(-1))
    bias_slab = bias_slab.at[R_B5, :D].set(params["b5"].reshape(-1))

    # --- packed, 128-aligned input slab: (x | 0 | noise | 0) ---
    xin = jnp.zeros((B, Pin), jnp.float32)
    xin = xin.at[:, :D].set(x).at[:, Dp:Dp + L].set(noise)

    kernel = _make_kernel(B, Dp, Hp, Lp, roff)

    # Advisory cost estimate (padded-dim matmul flops; exp over L, sigmoid ~ exp+recip).
    flops = 2 * B * (Dp * Hp + Hp * Hp + Hp * 2 * Lp + Lp * Hp + Hp * Hp + Hp * Dp)
    transcendentals = B * (L + 2 * D) + 4 * H
    xin_b, w_b, bias_b, out_b = xin.size * 4, w_slab.size * 2, bias_slab.size * 4, B * Pout * 4
    bytes_accessed = xin_b + w_b + bias_b + out_b

    # All slabs must be VMEM-resident in this grid-less design; size the scoped limit
    # explicitly (double-buffered slabs + elementwise intermediates + headroom), capped
    # at the v7x physical ceiling (64 MiB).
    vmem_need = 2 * bytes_accessed + 8 * B * max(Hp, Omax) * 4 + (4 << 20)
    vmem_limit = int(min(max(vmem_need, 16 << 20), 64 << 20))

    out = pl.pallas_call(
        kernel,
        out_shape=jax.ShapeDtypeStruct((B, Pout), jnp.float32),
        in_specs=[_full_spec(xin.shape),
                  _full_spec(w_slab.shape),
                  _full_spec(bias_slab.shape)],
        out_specs=_full_spec((B, Pout)),
        compiler_params=pltpu.CompilerParams(vmem_limit_bytes=vmem_limit),
        cost_estimate=pl.CostEstimate(flops=flops,
                                      transcendentals=transcendentals,
                                      bytes_accessed=bytes_accessed),
    )(xin, w_slab, bias_slab)

    # 128-aligned starts -> clean host-side slices.
    x_hat = out[:, :D]
    mu = out[:, Dp:Dp + L]
    logvar = out[:, Dp + Lp:Dp + Lp + L]
    return x_hat, mu, logvar


def init_params(key, input_dim, hidden_dim, latent_dim):
    """Deterministic synthetic parameters with the shapes MGVAE.__init__ implies.

    Linear weights are stored as [in, out] (transposed vs. nn.Linear's [out, in]).
    BN gamma=1, beta=0 (fresh nn.BatchNorm1d)."""
    ks = jax.random.split(key, 14)

    def lin(kw, kb, fan_in, fan_out):
        lim = 1.0 / jnp.sqrt(fan_in)
        w = jax.random.uniform(kw, (fan_in, fan_out), jnp.float32, -lim, lim)
        b = jax.random.uniform(kb, (1, fan_out), jnp.float32, -lim, lim)
        return w, b

    p = {}
    p["w1"], p["b1"] = lin(ks[0], ks[1], input_dim, hidden_dim)
    p["g1"], p["be1"] = jnp.ones((1, hidden_dim), jnp.float32), jnp.zeros((1, hidden_dim), jnp.float32)
    p["w2"], p["b2"] = lin(ks[2], ks[3], hidden_dim, hidden_dim)
    p["g2"], p["be2"] = jnp.ones((1, hidden_dim), jnp.float32), jnp.zeros((1, hidden_dim), jnp.float32)
    p["wmu"], p["bmu"] = lin(ks[4], ks[5], hidden_dim, latent_dim)
    p["wlv"], p["blv"] = lin(ks[6], ks[7], hidden_dim, latent_dim)
    p["w3"], p["b3"] = lin(ks[8], ks[9], latent_dim, hidden_dim)
    p["g3"], p["be3"] = jnp.ones((1, hidden_dim), jnp.float32), jnp.zeros((1, hidden_dim), jnp.float32)
    p["w4"], p["b4"] = lin(ks[10], ks[11], hidden_dim, hidden_dim)
    p["g4"], p["be4"] = jnp.ones((1, hidden_dim), jnp.float32), jnp.zeros((1, hidden_dim), jnp.float32)
    p["w5"], p["b5"] = lin(ks[12], ks[13], hidden_dim, input_dim)
    return p


def mgvae_forward_ref(x, noise, p, matmul_dtype=jnp.float32):
    """Pure-JAX reference of the original forward (pre-BN biases included, as in PyTorch;
    they cancel algebraically under training-mode BN). Matmul operands cast to
    `matmul_dtype`, everything else f32."""
    def mm(a, w):
        return jnp.dot(a.astype(matmul_dtype), w.astype(matmul_dtype),
                       preferred_element_type=jnp.float32)

    def bn_relu(h, g, b):
        mean = jnp.mean(h, axis=0, keepdims=True)
        msq = jnp.mean(h * h, axis=0, keepdims=True)
        var = msq - mean * mean
        scale = g * jax.lax.rsqrt(var + BN_EPS)
        return jnp.maximum(h * scale + (b - mean * scale), 0.0)

    h = bn_relu(mm(x, p["w1"]) + p["b1"], p["g1"], p["be1"])
    h = bn_relu(mm(h, p["w2"]) + p["b2"], p["g2"], p["be2"])
    mu = mm(h, p["wmu"]) + p["bmu"]
    logvar = mm(h, p["wlv"]) + p["blv"]
    z = mu + jnp.exp(0.5 * logvar) * noise
    d = bn_relu(mm(z, p["w3"]) + p["b3"], p["g3"], p["be3"])
    d = bn_relu(mm(d, p["w4"]) + p["b4"], p["g4"], p["be4"])
    xhat = jax.nn.sigmoid(mm(d, p["w5"]) + p["b5"])
    return xhat, mu, logvar


if __name__ == "__main__":
    # Small shapes consistent with the module: MLP VAE over flat feature vectors.
    B, input_dim, hidden_dim, latent_dim = 8, 32, 32, 16

    key = jax.random.PRNGKey(0)
    k_x, k_noise, k_params = jax.random.split(key, 3)

    # x in [0,1] (forward-compatible with the BCE reconstruction loss).
    x = jax.random.uniform(k_x, (B, input_dim), jnp.float32)
    # Pre-drawn standard-normal noise for the reparameterization (torch.randn_like).
    noise = jax.random.normal(k_noise, (B, latent_dim), jnp.float32)

    params = init_params(k_params, input_dim, hidden_dim, latent_dim)

    x_hat, mu, logvar = mgvae_forward(x, noise, params)
    jax.block_until_ready((x_hat, mu, logvar))

    # Sanity: shapes and finiteness.
    assert x_hat.shape == (B, input_dim)
    assert mu.shape == (B, latent_dim)
    assert logvar.shape == (B, latent_dim)
    assert bool(jnp.all(jnp.isfinite(x_hat)))
    assert bool(jnp.all(jnp.isfinite(mu)))
    assert bool(jnp.all(jnp.isfinite(logvar)))

    # Matched-precision reference (bf16 matmul operands, f32 elsewhere) — tight check.
    r_xhat, r_mu, r_lv = mgvae_forward_ref(x, noise, params, matmul_dtype=jnp.bfloat16)
    assert float(jnp.max(jnp.abs(x_hat - r_xhat))) < 3e-2
    assert float(jnp.max(jnp.abs(mu - r_mu))) < 3e-2
    assert float(jnp.max(jnp.abs(logvar - r_lv))) < 3e-2

    # Full-f32 reference — loose semantic check (bounds bf16-matmul quantization error).
    f_xhat, f_mu, f_lv = mgvae_forward_ref(x, noise, params, matmul_dtype=jnp.float32)
    assert float(jnp.max(jnp.abs(x_hat - f_xhat))) < 2.5e-1
    assert float(jnp.max(jnp.abs(mu - f_mu))) < 2.5e-1
    assert float(jnp.max(jnp.abs(logvar - f_lv))) < 2.5e-1

    print("KERNEL_OK")
</pallas_src>

<mosaic_0001>
module attributes {stable_mosaic.version = 11 : i64} {
  func.func @kernel(%arg0: memref<8x256xf32, #tpu.memory_space<vmem>>, %arg1: memref<768x256xbf16, #tpu.memory_space<vmem>>, %arg2: memref<10x256xf32, #tpu.memory_space<vmem>>, %arg3: memref<8x384xf32, #tpu.memory_space<vmem>>) attributes {dimension_semantics = [], scalar_prefetch = 0 : i64, scratch_operands = 0 : i64, tpu.core_type = #tpu.core_type<tc>} {
    %c0 = arith.constant 0 : index
    %c0_0 = arith.constant 0 : index
    %0 = vector.load %arg0[%c0, %c0_0] : memref<8x256xf32, #tpu.memory_space<vmem>>, vector<8x256xf32>
    %1 = vector.extract_strided_slice %0 {offsets = [0, 0], sizes = [8, 128], strides = [1, 1]} : vector<8x256xf32> to vector<8x128xf32>
    %2 = vector.extract_strided_slice %0 {offsets = [0, 128], sizes = [8, 128], strides = [1, 1]} : vector<8x256xf32> to vector<8x128xf32>
    %c0_1 = arith.constant 0 : index
    %c0_2 = arith.constant 0 : index
    %3 = vector.load %arg1[%c0_1, %c0_2] : memref<768x256xbf16, #tpu.memory_space<vmem>>, vector<128x128xbf16>
    %4 = arith.truncf %1 : vector<8x128xf32> to vector<8x128xbf16>
    %cst = arith.constant dense<0.000000e+00> : vector<8x128xf32>
    %5 = tpu.matmul %4, %3, %cst {dimension_numbers = #tpu.dot_dimension_numbers<[1], [0], [0], [1], [0, 0, 1, 1], [], []>} : vector<8x128xbf16>, vector<128x128xbf16>, vector<8x128xf32> -> vector<8x128xf32>
    %c0_3 = arith.constant 0 : index
    %c0_4 = arith.constant 0 : index
    %6 = vector.load %arg2[%c0_3, %c0_4] : memref<10x256xf32, #tpu.memory_space<vmem>>, vector<1x128xf32>
    %c1 = arith.constant 1 : index
    %c0_5 = arith.constant 0 : index
    %7 = vector.load %arg2[%c1, %c0_5] : memref<10x256xf32, #tpu.memory_space<vmem>>, vector<1x128xf32>
    %cst_6 = arith.constant dense<0.000000e+00> : vector<128xf32>
    %8 = vector.multi_reduction <add>, %5, %cst_6 [0] : vector<8x128xf32> to vector<128xf32>
    %9 = vector.shape_cast %8 : vector<128xf32> to vector<1x128xf32>
    %cst_7 = arith.constant 8.000000e+00 : f32
    %10 = vector.broadcast %cst_7 : f32 to vector<1x128xf32>
    %11 = arith.divf %9, %10 : vector<1x128xf32>
    %12 = arith.mulf %5, %5 : vector<8x128xf32>
    %cst_8 = arith.constant dense<0.000000e+00> : vector<128xf32>
    %13 = vector.multi_reduction <add>, %12, %cst_8 [0] : vector<8x128xf32> to vector<128xf32>
    %14 = vector.shape_cast %13 : vector<128xf32> to vector<1x128xf32>
    %cst_9 = arith.constant 8.000000e+00 : f32
    %15 = vector.broadcast %cst_9 : f32 to vector<1x128xf32>
    %16 = arith.divf %14, %15 : vector<1x128xf32>
    %17 = arith.mulf %11, %11 : vector<1x128xf32>
    %18 = arith.subf %16, %17 : vector<1x128xf32>
    %cst_10 = arith.constant 9.99999974E-6 : f32
    %19 = vector.broadcast %cst_10 : f32 to vector<1x128xf32>
    %20 = arith.addf %18, %19 : vector<1x128xf32>
    %21 = math.rsqrt %20 : vector<1x128xf32>
    %22 = arith.mulf %6, %21 : vector<1x128xf32>
    %23 = arith.mulf %11, %22 : vector<1x128xf32>
    %24 = arith.subf %7, %23 : vector<1x128xf32>
    %25 = vector.broadcast %22 : vector<1x128xf32> to vector<8x128xf32>
    %26 = arith.mulf %5, %25 : vector<8x128xf32>
    %27 = vector.broadcast %24 : vector<1x128xf32> to vector<8x128xf32>
    %28 = arith.addf %26, %27 : vector<8x128xf32>
    %cst_11 = arith.constant 0.000000e+00 : f32
    %29 = vector.broadcast %cst_11 : f32 to vector<8x128xf32>
    %30 = arith.maximumf %28, %29 : vector<8x128xf32>
    %c128 = arith.constant 128 : index
    %c0_12 = arith.constant 0 : index
    %31 = vector.load %arg1[%c128, %c0_12] : memref<768x256xbf16, #tpu.memory_space<vmem>>, vector<128x128xbf16>
    %32 = arith.truncf %30 : vector<8x128xf32> to vector<8x128xbf16>
    %cst_13 = arith.constant dense<0.000000e+00> : vector<8x128xf32>
    %33 = tpu.matmul %32, %31, %cst_13 {dimension_numbers = #tpu.dot_dimension_numbers<[1], [0], [0], [1], [0, 0, 1, 1], [], []>} : vector<8x128xbf16>, vector<128x128xbf16>, vector<8x128xf32> -> vector<8x128xf32>
    %c2 = arith.constant 2 : index
    %c0_14 = arith.constant 0 : index
    %34 = vector.load %arg2[%c2, %c0_14] : memref<10x256xf32, #tpu.memory_space<vmem>>, vector<1x128xf32>
    %c3 = arith.constant 3 : index
    %c0_15 = arith.constant 0 : index
    %35 = vector.load %arg2[%c3, %c0_15] : memref<10x256xf32, #tpu.memory_space<vmem>>, vector<1x128xf32>
    %cst_16 = arith.constant dense<0.000000e+00> : vector<128xf32>
    %36 = vector.multi_reduction <add>, %33, %cst_16 [0] : vector<8x128xf32> to vector<128xf32>
    %37 = vector.shape_cast %36 : vector<128xf32> to vector<1x128xf32>
    %cst_17 = arith.constant 8.000000e+00 : f32
    %38 = vector.broadcast %cst_17 : f32 to vector<1x128xf32>
    %39 = arith.divf %37, %38 : vector<1x128xf32>
    %40 = arith.mulf %33, %33 : vector<8x128xf32>
    %cst_18 = arith.constant dense<0.000000e+00> : vector<128xf32>
    %41 = vector.multi_reduction <add>, %40, %cst_18 [0] : vector<8x128xf32> to vector<128xf32>
    %42 = vector.shape_cast %41 : vector<128xf32> to vector<1x128xf32>
    %cst_19 = arith.constant 8.000000e+00 : f32
    %43 = vector.broadcast %cst_19 : f32 to vector<1x128xf32>
    %44 = arith.divf %42, %43 : vector<1x128xf32>
    %45 = arith.mulf %39, %39 : vector<1x128xf32>
    %46 = arith.subf %44, %45 : vector<1x128xf32>
    %cst_20 = arith.constant 9.99999974E-6 : f32
    %47 = vector.broadcast %cst_20 : f32 to vector<1x128xf32>
    %48 = arith.addf %46, %47 : vector<1x128xf32>
    %49 = math.rsqrt %48 : vector<1x128xf32>
    %50 = arith.mulf %34, %49 : vector<1x128xf32>
    %51 = arith.mulf %39, %50 : vector<1x128xf32>
    %52 = arith.subf %35, %51 : vector<1x128xf32>
    %53 = vector.broadcast %50 : vector<1x128xf32> to vector<8x128xf32>
    %54 = arith.mulf %33, %53 : vector<8x128xf32>
    %55 = vector.broadcast %52 : vector<1x128xf32> to vector<8x128xf32>
    %56 = arith.addf %54, %55 : vector<8x128xf32>
    %cst_21 = arith.constant 0.000000e+00 : f32
    %57 = vector.broadcast %cst_21 : f32 to vector<8x128xf32>
    %58 = arith.maximumf %56, %57 : vector<8x128xf32>
    %c256 = arith.constant 256 : index
    %c0_22 = arith.constant 0 : index
    %59 = vector.load %arg1[%c256, %c0_22] : memref<768x256xbf16, #tpu.memory_space<vmem>>, vector<128x256xbf16>
    %60 = arith.truncf %58 : vector<8x128xf32> to vector<8x128xbf16>
    %cst_23 = arith.constant dense<0.000000e+00> : vector<8x256xf32>
    %61 = tpu.matmul %60, %59, %cst_23 {dimension_numbers = #tpu.dot_dimension_numbers<[1], [0], [0], [1], [0, 0, 1, 1], [], []>} : vector<8x128xbf16>, vector<128x256xbf16>, vector<8x256xf32> -> vector<8x256xf32>
    %c4 = arith.constant 4 : index
    %c0_24 = arith.constant 0 : index
    %62 = vector.load %arg2[%c4, %c0_24] : memref<10x256xf32, #tpu.memory_space<vmem>>, vector<1x256xf32>
    %63 = vector.broadcast %62 : vector<1x256xf32> to vector<8x256xf32>
    %64 = arith.addf %61, %63 : vector<8x256xf32>
    %65 = vector.extract_strided_slice %64 {offsets = [0, 0], sizes = [8, 128], strides = [1, 1]} : vector<8x256xf32> to vector<8x128xf32>
    %66 = vector.extract_strided_slice %64 {offsets = [0, 128], sizes = [8, 128], strides = [1, 1]} : vector<8x256xf32> to vector<8x128xf32>
    %cst_25 = arith.constant 5.000000e-01 : f32
    %67 = vector.broadcast %cst_25 : f32 to vector<8x128xf32>
    %68 = arith.mulf %67, %66 : vector<8x128xf32>
    %69 = math.exp %68 : vector<8x128xf32>
    %70 = arith.mulf %69, %2 : vector<8x128xf32>
    %71 = arith.addf %65, %70 : vector<8x128xf32>
    %c384 = arith.constant 384 : index
    %c0_26 = arith.constant 0 : index
    %72 = vector.load %arg1[%c384, %c0_26] : memref<768x256xbf16, #tpu.memory_space<vmem>>, vector<128x128xbf16>
    %73 = arith.truncf %71 : vector<8x128xf32> to vector<8x128xbf16>
    %cst_27 = arith.constant dense<0.000000e+00> : vector<8x128xf32>
    %74 = tpu.matmul %73, %72, %cst_27 {dimension_numbers = #tpu.dot_dimension_numbers<[1], [0], [0], [1], [0, 0, 1, 1], [], []>} : vector<8x128xbf16>, vector<128x128xbf16>, vector<8x128xf32> -> vector<8x128xf32>
    %c5 = arith.constant 5 : index
    %c0_28 = arith.constant 0 : index
    %75 = vector.load %arg2[%c5, %c0_28] : memref<10x256xf32, #tpu.memory_space<vmem>>, vector<1x128xf32>
    %c6 = arith.constant 6 : index
    %c0_29 = arith.constant 0 : index
    %76 = vector.load %arg2[%c6, %c0_29] : memref<10x256xf32, #tpu.memory_space<vmem>>, vector<1x128xf32>
    %cst_30 = arith.constant dense<0.000000e+00> : vector<128xf32>
    %77 = vector.multi_reduction <add>, %74, %cst_30 [0] : vector<8x128xf32> to vector<128xf32>
    %78 = vector.shape_cast %77 : vector<128xf32> to vector<1x128xf32>
    %cst_31 = arith.constant 8.000000e+00 : f32
    %79 = vector.broadcast %cst_31 : f32 to vector<1x128xf32>
    %80 = arith.divf %78, %79 : vector<1x128xf32>
    %81 = arith.mulf %74, %74 : vector<8x128xf32>
    %cst_32 = arith.constant dense<0.000000e+00> : vector<128xf32>
    %82 = vector.multi_reduction <add>, %81, %cst_32 [0] : vector<8x128xf32> to vector<128xf32>
    %83 = vector.shape_cast %82 : vector<128xf32> to vector<1x128xf32>
    %cst_33 = arith.constant 8.000000e+00 : f32
    %84 = vector.broadcast %cst_33 : f32 to vector<1x128xf32>
    %85 = arith.divf %83, %84 : vector<1x128xf32>
    %86 = arith.mulf %80, %80 : vector<1x128xf32>
    %87 = arith.subf %85, %86 : vector<1x128xf32>
    %cst_34 = arith.constant 9.99999974E-6 : f32
    %88 = vector.broadcast %cst_34 : f32 to vector<1x128xf32>
    %89 = arith.addf %87, %88 : vector<1x128xf32>
    %90 = math.rsqrt %89 : vector<1x128xf32>
    %91 = arith.mulf %75, %90 : vector<1x128xf32>
    %92 = arith.mulf %80, %91 : vector<1x128xf32>
    %93 = arith.subf %76, %92 : vector<1x128xf32>
    %94 = vector.broadcast %91 : vector<1x128xf32> to vector<8x128xf32>
    %95 = arith.mulf %74, %94 : vector<8x128xf32>
    %96 = vector.broadcast %93 : vector<1x128xf32> to vector<8x128xf32>
    %97 = arith.addf %95, %96 : vector<8x128xf32>
    %cst_35 = arith.constant 0.000000e+00 : f32
    %98 = vector.broadcast %cst_35 : f32 to vector<8x128xf32>
    %99 = arith.maximumf %97, %98 : vector<8x128xf32>
    %c512 = arith.constant 512 : index
    %c0_36 = arith.constant 0 : index
    %100 = vector.load %arg1[%c512, %c0_36] : memref<768x256xbf16, #tpu.memory_space<vmem>>, vector<128x128xbf16>
    %101 = arith.truncf %99 : vector<8x128xf32> to vector<8x128xbf16>
    %cst_37 = arith.constant dense<0.000000e+00> : vector<8x128xf32>
    %102 = tpu.matmul %101, %100, %cst_37 {dimension_numbers = #tpu.dot_dimension_numbers<[1], [0], [0], [1], [0, 0, 1, 1], [], []>} : vector<8x128xbf16>, vector<128x128xbf16>, vector<8x128xf32> -> vector<8x128xf32>
    %c7 = arith.constant 7 : index
    %c0_38 = arith.constant 0 : index
    %103 = vector.load %arg2[%c7, %c0_38] : memref<10x256xf32, #tpu.memory_space<vmem>>, vector<1x128xf32>
    %c8 = arith.constant 8 : index
    %c0_39 = arith.constant 0 : index
    %104 = vector.load %arg2[%c8, %c0_39] : memref<10x256xf32, #tpu.memory_space<vmem>>, vector<1x128xf32>
    %cst_40 = arith.constant dense<0.000000e+00> : vector<128xf32>
    %105 = vector.multi_reduction <add>, %102, %cst_40 [0] : vector<8x128xf32> to vector<128xf32>
    %106 = vector.shape_cast %105 : vector<128xf32> to vector<1x128xf32>
    %cst_41 = arith.constant 8.000000e+00 : f32
    %107 = vector.broadcast %cst_41 : f32 to vector<1x128xf32>
    %108 = arith.divf %106, %107 : vector<1x128xf32>
    %109 = arith.mulf %102, %102 : vector<8x128xf32>
    %cst_42 = arith.constant dense<0.000000e+00> : vector<128xf32>
    %110 = vector.multi_reduction <add>, %109, %cst_42 [0] : vector<8x128xf32> to vector<128xf32>
    %111 = vector.shape_cast %110 : vector<128xf32> to vector<1x128xf32>
    %cst_43 = arith.constant 8.000000e+00 : f32
    %112 = vector.broadcast %cst_43 : f32 to vector<1x128xf32>
    %113 = arith.divf %111, %112 : vector<1x128xf32>
    %114 = arith.mulf %108, %108 : vector<1x128xf32>
    %115 = arith.subf %113, %114 : vector<1x128xf32>
    %cst_44 = arith.constant 9.99999974E-6 : f32
    %116 = vector.broadcast %cst_44 : f32 to vector<1x128xf32>
    %117 = arith.addf %115, %116 : vector<1x128xf32>
    %118 = math.rsqrt %117 : vector<1x128xf32>
    %119 = arith.mulf %103, %118 : vector<1x128xf32>
    %120 = arith.mulf %108, %119 : vector<1x128xf32>
    %121 = arith.subf %104, %120 : vector<1x128xf32>
    %122 = vector.broadcast %119 : vector<1x128xf32> to vector<8x128xf32>
    %123 = arith.mulf %102, %122 : vector<8x128xf32>
    %124 = vector.broadcast %121 : vector<1x128xf32> to vector<8x128xf32>
    %125 = arith.addf %123, %124 : vector<8x128xf32>
    %cst_45 = arith.constant 0.000000e+00 : f32
    %126 = vector.broadcast %cst_45 : f32 to vector<8x128xf32>
    %127 = arith.maximumf %125, %126 : vector<8x128xf32>
    %c640 = arith.constant 640 : index
    %c0_46 = arith.constant 0 : index
    %128 = vector.load %arg1[%c640, %c0_46] : memref<768x256xbf16, #tpu.memory_space<vmem>>, vector<128x128xbf16>
    %129 = arith.truncf %127 : vector<8x128xf32> to vector<8x128xbf16>
    %cst_47 = arith.constant dense<0.000000e+00> : vector<8x128xf32>
    %130 = tpu.matmul %129, %128, %cst_47 {dimension_numbers = #tpu.dot_dimension_numbers<[1], [0], [0], [1], [0, 0, 1, 1], [], []>} : vector<8x128xbf16>, vector<128x128xbf16>, vector<8x128xf32> -> vector<8x128xf32>
    %c9 = arith.constant 9 : index
    %c0_48 = arith.constant 0 : index
    %131 = vector.load %arg2[%c9, %c0_48] : memref<10x256xf32, #tpu.memory_space<vmem>>, vector<1x128xf32>
    %132 = vector.broadcast %131 : vector<1x128xf32> to vector<8x128xf32>
    %133 = arith.addf %130, %132 : vector<8x128xf32>
    %134 = arith.negf %133 : vector<8x128xf32>
    %135 = math.exp %134 : vector<8x128xf32>
    %cst_49 = arith.constant 1.000000e+00 : f32
    %136 = vector.broadcast %cst_49 : f32 to vector<8x128xf32>
    %137 = arith.addf %136, %135 : vector<8x128xf32>
    %138 = arith.divf %136, %137 : vector<8x128xf32>
    %139 = tpu.concatenate %138, %65, %66 in 1 : vector<8x128xf32>, vector<8x128xf32>, vector<8x128xf32> -> vector<8x384xf32>
    %c0_50 = arith.constant 0 : index
    %c0_51 = arith.constant 0 : index
    %140 = vector.load %arg3[%c0_50, %c0_51] : memref<8x384xf32, #tpu.memory_space<vmem>>, vector<8x384xf32>
    tpu.vector_store %arg3[%c0_50, %c0_51], %139 {strides = array<i32>} : memref<8x384xf32, #tpu.memory_space<vmem>>, vector<8x384xf32>,
    return
  }
}

</mosaic_0001>

<bundles_post_ra>
// kernel: mgvae_forward.1
= control target key start
LH: loop header
LB: loop body
LE: loop exit
PB: predicated region body
PF: predicated region fallthrough
CT: control target
= control target key end

     0   :  { %v1105_v0 = vmov 0.0   ;;  %vm1106_vm0 = vmmov 0   ;;  %s1391_s1 = inlined_call_operand.vmem [shape: bf16[768,256], index: 1, kind: input, shape index: {}]   ;;  %s1392_s0 = inlined_call_operand.vmem [shape: f32[8,256], index: 0, kind: input, shape index: {}]   ;;  %s1393_s2 = inlined_call_operand.vmem [shape: f32[10,256], index: 2, kind: input, shape index: {}]   ;;  %s1394_s3 = inlined_call_operand.vmem [shape: f32[8,384], index: 3, kind: output, shape index: {}]  }
   0x1   :  { %924 = vmatprep.subr.bf16.mxu0 %v1105_v0  ;;  %v1027_v1 = vld [vmem:[%s1391_s1 + $0x70] ss:$8 sps:$4 sm:$0xff]   ;;  %940 = vmatprep.mubr.msk.bf16.mxu0 %vm1106_vm0, %v1105_v0  ;;  %v1028_v2 = vld [vmem:[%s1391_s1 + $0x60] ss:$8 sps:$4 sm:$0xff]   ;;  %v1045_v51 = vld [vmem:[%s1391_s1 + $0x174] ss:$8 sps:$4 sm:$0xff]  }
   0x2   :  { %944 = vmatprep.subr.bf16.mxu1 %v1105_v0  ;;  %960 = vmatprep.mubr.msk.bf16.mxu1 %vm1106_vm0, %v1105_v0  ;;  %v1029_v3 = vld [vmem:[%s1391_s1 + $0x50] ss:$8 sps:$4 sm:$0xff]   ;;  %v1030_v4 = vld [vmem:[%s1391_s1 + $0x40] ss:$8 sps:$4 sm:$0xff]   ;;  %v1048_v53 = vld [vmem:[%s1391_s1 + $0x164] ss:$8 sps:$4 sm:$0xff]  }
   0x3   :  { %925 = vmatpush3.bf16.msra.mxu0 %v1027_v1  ;;  %v1031_v5 = vld [vmem:[%s1391_s1 + $0x30] ss:$8 sps:$4 sm:$0xff]   ;;  %v1032_v6 = vld [vmem:[%s1391_s1 + $0x20] ss:$8 sps:$4 sm:$0xff]   ;;  %v1051_v55 = vld [vmem:[%s1391_s1 + $0x154] ss:$8 sps:$4 sm:$0xff]  }
   0x4   :  { %926 = vmatprep.subr.bf16.mxu0 %v1105_v0  ;;  %v1033_v7 = vld [vmem:[%s1391_s1 + $0x10] ss:$8 sps:$4 sm:$0xff]   ;;  %v1034_v8 = vld [vmem:[%s1391_s1] ss:$8 sps:$4 sm:$0xff]   ;;  %v1054_v57 = vld [vmem:[%s1391_s1 + $0x144] ss:$8 sps:$4 sm:$0xff]  }
   0x5   :  { %v15_v9 = vld [vmem:[%s1392_s0] sm:$0xff]  ;;  %v1035_v11 = vld [vmem:[%s1391_s1 + $0xf0] ss:$8 sps:$4 sm:$0xff]   ;;  %v1057_v59 = vld [vmem:[%s1391_s1 + $0x134] ss:$8 sps:$4 sm:$0xff]  }
   0x6   :  { %v33_v10 = vpack.c.bf16 %v15_v9, %v15_v9  ;;  %945 = vmatpush3.bf16.msra.mxu1 %v1035_v11  ;;  %v1036_v12 = vld [vmem:[%s1391_s1 + $0xe0] ss:$8 sps:$4 sm:$0xff]   ;;  %v1037_v13 = vld [vmem:[%s1391_s1 + $0xd0] ss:$8 sps:$4 sm:$0xff]   ;;  %v1060_v61 = vld [vmem:[%s1391_s1 + $0x124] ss:$8 sps:$4 sm:$0xff]  }
   0x7   :  { %927 = vmatpush3.bf16.msra.mxu0 %v1028_v2  ;;  %946 = vmatprep.subr.bf16.mxu1 %v1105_v0  ;;  %v1038_v14 = vld [vmem:[%s1391_s1 + $0xc0] ss:$8 sps:$4 sm:$0xff]   ;;  %v1039_v15 = vld [vmem:[%s1391_s1 + $0xb0] ss:$8 sps:$4 sm:$0xff]   ;;  %v1063_v63 = vld [vmem:[%s1391_s1 + $0x114] ss:$8 sps:$4 sm:$0xff]  }
   0x8   :  { %928 = vmatprep.subr.bf16.mxu0 %v1105_v0  ;;  %v1040_v16 = vld [vmem:[%s1391_s1 + $0xa0] ss:$8 sps:$4 sm:$0xff]   ;;  %v1041_v17 = vld [vmem:[%s1391_s1 + $0x90] ss:$8 sps:$4 sm:$0xff]  }
   0x9   :  { %v1042_v18 = vld [vmem:[%s1391_s1 + $0x80] ss:$8 sps:$4 sm:$0xff]   ;;  %v1043_v52 = vld [vmem:[%s1391_s1 + $0x170] ss:$8 sps:$4 sm:$0xff]  }
   0xa   :  { %947 = vmatpush3.bf16.msra.mxu1 %v1036_v12  ;;  %v122_v41 = vld [vmem:[%s1393_s2] ss:$0 sm:$0xff]  ;;  %v123_v44 = vld [vmem:[%s1393_s2 + $0x1] ss:$0 sm:$0xff]  ;;  %v1049_v56 = vld [vmem:[%s1391_s1 + $0x150] ss:$8 sps:$4 sm:$0xff]  }
   0xb   :  { %929 = vmatpush3.bf16.msra.mxu0 %v1029_v3  ;;  %948 = vmatprep.subr.bf16.mxu1 %v1105_v0  ;;  %v1046_v54 = vld [vmem:[%s1391_s1 + $0x160] ss:$8 sps:$4 sm:$0xff]   ;;  %v1055_v60 = vld [vmem:[%s1391_s1 + $0x130] ss:$8 sps:$4 sm:$0xff]   ;;  %v1066_v3 = vld [vmem:[%s1391_s1 + $0x104] ss:$8 sps:$4 sm:$0xff]  }
   0xc   :  { %930 = vmatprep.subr.bf16.mxu0 %v1105_v0  ;;  %v1052_v58 = vld [vmem:[%s1391_s1 + $0x140] ss:$8 sps:$4 sm:$0xff]   ;;  %v1061_v1 = vld [vmem:[%s1391_s1 + $0x110] ss:$8 sps:$4 sm:$0xff]  }
   0xd   :  { %v1058_v62 = vld [vmem:[%s1391_s1 + $0x120] ss:$8 sps:$4 sm:$0xff]  }
   0xe   :  { %949 = vmatpush3.bf16.msra.mxu1 %v1037_v13  ;;  %v1064_v2 = vld [vmem:[%s1391_s1 + $0x100] ss:$8 sps:$4 sm:$0xff]  }
   0xf   :  { %931 = vmatpush3.bf16.msra.mxu0 %v1030_v4  ;;  %950 = vmatprep.subr.bf16.mxu1 %v1105_v0  ;;  %v1107_v4 = vmov 0  }
  0x10   :  { %932 = vmatprep.subr.bf16.mxu0 %v1105_v0 }
  0x12   :  { %951 = vmatpush3.bf16.msra.mxu1 %v1038_v14 }
  0x13   :  { %933 = vmatpush3.bf16.msra.mxu0 %v1031_v5  ;;  %952 = vmatprep.subr.bf16.mxu1 %v1105_v0  ;;  %v1067_v5 = vld [vmem:[%s1391_s1 + $0x1f0] ss:$8 sps:$4 sm:$0xff]  }
  0x14   :  { %934 = vmatprep.subr.bf16.mxu0 %v1105_v0 }
  0x16   :  { %953 = vmatpush3.bf16.msra.mxu1 %v1039_v15 }
  0x17   :  { %935 = vmatpush3.bf16.msra.mxu0 %v1032_v6  ;;  %954 = vmatprep.subr.bf16.mxu1 %v1105_v0 }
  0x18   :  { %936 = vmatprep.subr.bf16.mxu0 %v1105_v0 }
  0x1a   :  { %955 = vmatpush3.bf16.msra.mxu1 %v1040_v16 }
  0x1b   :  { %937 = vmatpush3.bf16.msra.mxu0 %v1033_v7  ;;  %956 = vmatprep.subr.bf16.mxu1 %v1105_v0 }
  0x1c   :  { %938 = vmatprep.subr.bf16.mxu0 %v1105_v0 }
  0x1e   :  { %957 = vmatpush3.bf16.msra.mxu1 %v1041_v17 }
  0x1f   :  { %939 = vmatpush3.bf16.msra.mxu0 %v1034_v8  ;;  %958 = vmatprep.subr.bf16.mxu1 %v1105_v0 }
  0x20   :  { %392 = vmatprep.subr.bf16.mxu0 %v1045_v51 }
  0x22   :  { %941 = vmatmul.mubr.bf16.vlgmr.msra.gmra.mxu0 %v33_v10  ;;  %959 = vmatpush3.bf16.msra.mxu1 %v1042_v18 }
  0x23   :  { %964 = vmatprep.subr.bf16.mxu1 %v1105_v0  ;;  %393 = vmatpush1.bf16.msra.mxu0 %v1043_v52 }
  0x24   :  { %394 = vmatprep.subr.bf16.mxu0 %v1048_v53  ;;  %424 = vmatprep.mubr.bf16.mxu0 %v1107_v4  ;;  %v1077_v4 = vld [vmem:[%s1391_s1 + $0x250] ss:$8 sps:$4 sm:$0xff]  }
  0x27   :  { %395 = vmatpush1.bf16.msra.mxu0 %v1046_v54 }
  0x28   :  { %396 = vmatprep.subr.bf16.mxu0 %v1051_v55 }
  0x2b   :  { %397 = vmatpush1.bf16.msra.mxu0 %v1049_v56 }
  0x2c   :  { %398 = vmatprep.subr.bf16.mxu0 %v1054_v57 }
  0x2f   :  { %399 = vmatpush1.bf16.msra.mxu0 %v1052_v58 }
  0x30   :  { %400 = vmatprep.subr.bf16.mxu0 %v1057_v59 }
  0x33   :  { %401 = vmatpush1.bf16.msra.mxu0 %v1055_v60  ;;  %v16_v60 = vld [vmem:[%s1392_s0 + $0x8] sm:$0xff] }
  0x34   :  { %402 = vmatprep.subr.bf16.mxu0 %v1060_v61 }
  0x37   :  { %403 = vmatpush1.bf16.msra.mxu0 %v1058_v62 }
  0x38   :  { %404 = vmatprep.subr.bf16.mxu0 %v1063_v63 }
  0x3b   :  { %405 = vmatpush1.bf16.msra.mxu0 %v1061_v1 }
  0x3c   :  { %406 = vmatprep.subr.bf16.mxu0 %v1066_v3  ;;  %v1076_v3 = vld [vmem:[%s1391_s1 + $0x260] ss:$8 sps:$4 sm:$0xff]  }
  0x3f   :  { %407 = vmatpush1.bf16.msra.mxu0 %v1064_v2  ;;  %v1075_v2 = vld [vmem:[%s1391_s1 + $0x270] ss:$8 sps:$4 sm:$0xff]  }
  0x40   :  { %984 = vmatprep.subr.bf16.mxu0 %v1105_v0 }
  0xe2   :  { %v116_v19 = vpop.f32.mrf.mxu0 }
  0xe3   :  { %v124_v20 = vrot.slane %v116_v19, 4  ;;  %v132_v21 = vmul.f32 %v116_v19, %v116_v19 }
  0xe4   :  { %v942_v22 = vpop.f32.mrf.mxu0 }
  0xe5   :  { %v125_v23 = vadd.f32 %v124_v20, %v116_v19  ;;  %v133_v24 = vrot.slane %v132_v21, 4 }
  0xe6   :  { %v119_v25 = vpop.f32.mrf.mxu0 }
  0xe7   :  { %v126_v26 = vrot.slane %v125_v23, 2  ;;  %v134_v27 = vadd.f32 %v133_v24, %v132_v21 }
  0xe8   :  { %v943_v28 = vpop.f32.mrf.mxu0 }
  0xe9   :  { %v127_v29 = vadd.f32 %v126_v26, %v125_v23  ;;  %v135_v30 = vrot.slane %v134_v27, 2  ;;  %v255_v28 = vld [vmem:[%s1393_s2 + $0x2] ss:$0 sm:$0xff] }
  0xeb   :  { %v128_v31 = vrot.slane %v127_v29, 1  ;;  %v136_v32 = vadd.f32 %v135_v30, %v134_v27 }
  0xed   :  { %v129_v33 = vadd.f32 %v128_v31, %v127_v29  ;;  %v137_v34 = vrot.slane %v136_v32, 1  ;;  %v256_v31 = vld [vmem:[%s1393_s2 + $0x3] ss:$0 sm:$0xff] }
  0xef   :  { %v131_v35 = vmul.f32 0.125, %v129_v33  ;;  %v138_v36 = vadd.f32 %v137_v34, %v136_v32 }
  0xf1   :  { %v139_v37 = vmul.f32 0.125, %v138_v36  ;;  %v140_v38 = vmul.f32 %v131_v35, %v131_v35 }
  0xf3   :  { %v141_v39 = vsub.f32 %v139_v37, %v140_v38  ;;  %v1068_v38 = vld [vmem:[%s1391_s1 + $0x1e0] ss:$8 sps:$4 sm:$0xff]  }
  0xf5   :  { %v142_v40 = vadd.f32 1e-05, %v141_v39  ;;  %v1069_v39 = vld [vmem:[%s1391_s1 + $0x1d0] ss:$8 sps:$4 sm:$0xff]  }
  0xf7   :  { %1091 = vrsqrt.f32 %v142_v40  ;;  %v1070_v40 = vld [vmem:[%s1391_s1 + $0x1c0] ss:$8 sps:$4 sm:$0xff]  }
 0x104   :  { %v1092_v42 = vpop.eup %1091 }
 0x105   :  { %v144_v43 = vmul.f32 %v1092_v42, %v122_v41  ;;  %v1071_v41 = vld [vmem:[%s1391_s1 + $0x1b0] ss:$8 sps:$4 sm:$0xff]   ;;  %v1072_v42 = vld [vmem:[%s1391_s1 + $0x1a0] ss:$8 sps:$4 sm:$0xff]  }
 0x107   :  { %v145_v45 = vmul.f32 %v144_v43, %v131_v35  ;;  %v147_v46 = vmul.f32 %v144_v43, %v116_v19  ;;  %v1073_v43 = vld [vmem:[%s1391_s1 + $0x190] ss:$8 sps:$4 sm:$0xff]  }
 0x109   :  { %v146_v47 = vsub.f32 %v123_v44, %v145_v45  ;;  %v1074_v44 = vld [vmem:[%s1391_s1 + $0x180] ss:$8 sps:$4 sm:$0xff]   ;;  %v302_v45 = vlaneseq }
 0x10b   :  { %v148_v48 = vadd.f32 %v147_v46, %v146_v47  ;;  %v303_v46 = vshrl.u32 %v302_v45, 7  ;;  %v1086_v45 = vld [vmem:[%s1391_s1 + $0x2c0] ss:$8 sps:$4 sm:$0xff]  }
 0x10d   :  { %v149_v49 = vmax.f32 %v148_v48, 0.0  ;;  %v304_v47 = vsub.s32 0, %v303_v46  ;;  %v837_v48 = vld [vmem:[%s1393_s2 + $0x4] ss:$8 sm:$0x3] }
 0x10f   :  { %v166_v50 = vpack.c.bf16 %v149_v49, %v149_v49  ;;  %v308_v49 = vsub.s32 1, %v303_v46  ;;  %v1087_v46 = vld [vmem:[%s1391_s1 + $0x2b0] ss:$8 sps:$4 sm:$0xff]  }
 0x111   :  { %961 = vmatmul.mubr.bf16.vlgmr.msra.gmra.mxu1 %v166_v50  ;;  %v305_v50 = vrot.slane %v837_v48, %v304_v47  ;;  %v309_v51 = vrot.slane %v837_v48, %v308_v49  ;;  %v1088_v47 = vld [vmem:[%s1391_s1 + $0x2a0] ss:$8 sps:$4 sm:$0xff]   ;;  %v1089_v48 = vld [vmem:[%s1391_s1 + $0x290] ss:$8 sps:$4 sm:$0xff]  }
 0x112   :  { %980 = vmatprep.mubr.msk.bf16.mxu1 %vm1106_vm0, %v1105_v0  ;;  %965 = vmatpush3.bf16.msra.mxu1 %v1067_v5  ;;  %v1078_v5 = vld [vmem:[%s1391_s1 + $0x240] ss:$8 sps:$4 sm:$0xff]  }
 0x113   :  { %966 = vmatprep.subr.bf16.mxu1 %v1105_v0  ;;  %v1090_v49 = vld [vmem:[%s1391_s1 + $0x280] ss:$8 sps:$4 sm:$0xff]  }
 0x116   :  { %967 = vmatpush3.bf16.msra.mxu1 %v1068_v38 }
 0x117   :  { %968 = vmatprep.subr.bf16.mxu1 %v1105_v0 }
 0x11a   :  { %969 = vmatpush3.bf16.msra.mxu1 %v1069_v39 }
 0x11b   :  { %970 = vmatprep.subr.bf16.mxu1 %v1105_v0 }
 0x11e   :  { %971 = vmatpush3.bf16.msra.mxu1 %v1070_v40 }
 0x11f   :  { %972 = vmatprep.subr.bf16.mxu1 %v1105_v0 }
 0x122   :  { %973 = vmatpush3.bf16.msra.mxu1 %v1071_v41 }
 0x123   :  { %974 = vmatprep.subr.bf16.mxu1 %v1105_v0 }
 0x126   :  { %975 = vmatpush3.bf16.msra.mxu1 %v1072_v42  ;;  %v1083_v42 = vld [vmem:[%s1391_s1 + $0x2f0] ss:$8 sps:$4 sm:$0xff]  }
 0x127   :  { %976 = vmatprep.subr.bf16.mxu1 %v1105_v0 }
 0x12a   :  { %977 = vmatpush3.bf16.msra.mxu1 %v1073_v43  ;;  %v1084_v43 = vld [vmem:[%s1391_s1 + $0x2e0] ss:$8 sps:$4 sm:$0xff]  }
 0x12b   :  { %978 = vmatprep.subr.bf16.mxu1 %v1105_v0 }
 0x12e   :  { %979 = vmatpush3.bf16.msra.mxu1 %v1074_v44  ;;  %v1085_v44 = vld [vmem:[%s1391_s1 + $0x2d0] ss:$8 sps:$4 sm:$0xff]  }
 0x12f   :  { %1004 = vmatprep.subr.bf16.mxu1 %v1105_v0 }
 0x1d1   :  { %v249_v6 = vpop.f32.mrf.mxu1 }
 0x1d2   :  { %v257_v7 = vrot.slane %v249_v6, 4  ;;  %v264_v8 = vmul.f32 %v249_v6, %v249_v6 }
 0x1d3   :  { %v962_v9 = vpop.f32.mrf.mxu1 }
 0x1d4   :  { %v258_v10 = vadd.f32 %v257_v7, %v249_v6  ;;  %v265_v11 = vrot.slane %v264_v8, 4  ;;  %v1080_v7 = vld [vmem:[%s1391_s1 + $0x220] ss:$8 sps:$4 sm:$0xff]  }
 0x1d5   :  { %v252_v12 = vpop.f32.mrf.mxu1  ;;  %v1082_v9 = vld [vmem:[%s1391_s1 + $0x200] ss:$8 sps:$4 sm:$0xff]  }
 0x1d6   :  { %v259_v13 = vrot.slane %v258_v10, 2  ;;  %v266_v14 = vadd.f32 %v265_v11, %v264_v8  ;;  %v1081_v8 = vld [vmem:[%s1391_s1 + $0x210] ss:$8 sps:$4 sm:$0xff]  }
 0x1d7   :  { %v963_v15 = vpop.f32.mrf.mxu1 }
 0x1d8   :  { %v260_v16 = vadd.f32 %v259_v13, %v258_v10  ;;  %v267_v17 = vrot.slane %v266_v14, 2 }
 0x1da   :  { %v261_v18 = vrot.slane %v260_v16, 1  ;;  %v268_v19 = vadd.f32 %v267_v17, %v266_v14 }
 0x1dc   :  { %v262_v20 = vadd.f32 %v261_v18, %v260_v16  ;;  %v269_v21 = vrot.slane %v268_v19, 1 }
 0x1de   :  { %v263_v22 = vmul.f32 0.125, %v262_v20  ;;  %v270_v23 = vadd.f32 %v269_v21, %v268_v19 }
 0x1e0   :  { %v271_v24 = vmul.f32 0.125, %v270_v23  ;;  %v272_v25 = vmul.f32 %v263_v22, %v263_v22 }
 0x1e2   :  { %v273_v26 = vsub.f32 %v271_v24, %v272_v25 }
 0x1e4   :  { %v274_v27 = vadd.f32 1e-05, %v273_v26 }
 0x1e6   :  { %1093 = vrsqrt.f32 %v274_v27 }
 0x1f3   :  { %v1094_v29 = vpop.eup %1093 }
 0x1f4   :  { %v276_v30 = vmul.f32 %v1094_v29, %v255_v28 }
 0x1f6   :  { %v277_v32 = vmul.f32 %v276_v30, %v263_v22  ;;  %v279_v34 = vmul.f32 %v276_v30, %v249_v6  ;;  %v1079_v6 = vld [vmem:[%s1391_s1 + $0x230] ss:$8 sps:$4 sm:$0xff]  }
 0x1f8   :  { %v278_v33 = vsub.f32 %v256_v31, %v277_v32  ;;  %v543_v32 = vld [vmem:[%s1393_s2 + $0x5] ss:$0 sm:$0xff] }
 0x1fa   :  { %v280_v35 = vadd.f32 %v279_v34, %v278_v33 }
 0x1fc   :  { %v281_v36 = vmax.f32 %v280_v35, 0.0  ;;  %v544_v35 = vld [vmem:[%s1393_s2 + $0x6] ss:$0 sm:$0xff] }
 0x1fe   :  { %v298_v37 = vpack.c.bf16 %v281_v36, %v281_v36 }
 0x200   :  { %425 = vmatmul.mubr.bf16.vlgmr.msra.gmra.mxu0 %v298_v37 }
 0x201   :  { %1000 = vmatprep.mubr.msk.bf16.mxu0 %vm1106_vm0, %v1105_v0  ;;  %985 = vmatpush3.bf16.msra.mxu0 %v1075_v2 }
 0x202   :  { %986 = vmatprep.subr.bf16.mxu0 %v1105_v0 }
 0x205   :  { %987 = vmatpush3.bf16.msra.mxu0 %v1076_v3 }
 0x206   :  { %988 = vmatprep.subr.bf16.mxu0 %v1105_v0 }
 0x209   :  { %989 = vmatpush3.bf16.msra.mxu0 %v1077_v4 }
 0x20a   :  { %990 = vmatprep.subr.bf16.mxu0 %v1105_v0 }
 0x20d   :  { %991 = vmatpush3.bf16.msra.mxu0 %v1078_v5 }
 0x20e   :  { %992 = vmatprep.subr.bf16.mxu0 %v1105_v0 }
 0x211   :  { %993 = vmatpush3.bf16.msra.mxu0 %v1079_v6 }
 0x212   :  { %994 = vmatprep.subr.bf16.mxu0 %v1105_v0 }
 0x215   :  { %995 = vmatpush3.bf16.msra.mxu0 %v1080_v7 }
 0x216   :  { %996 = vmatprep.subr.bf16.mxu0 %v1105_v0 }
 0x219   :  { %997 = vmatpush3.bf16.msra.mxu0 %v1081_v8  ;;  %v675_v8 = vld [vmem:[%s1393_s2 + $0x7] ss:$0 sm:$0xff] }
 0x21a   :  { %998 = vmatprep.subr.bf16.mxu0 %v1105_v0 }
 0x21d   :  { %999 = vmatpush3.bf16.msra.mxu0 %v1082_v9 }
 0x2c0   :  { %v426_v52 = vpop.f32.mrf.mxu0 }
 0x2c1   :  { %v427_v53 = vadd.f32 %v426_v52, %v305_v50 }
 0x2c2   :  { %v428_v54 = vpop.f32.mrf.mxu0 }
 0x2c3   :  { %815 = vst [vmem:[%s1394_s3 + $0x8] sm:$0xff] %v427_v53  ;;  %v429_v55 = vadd.f32 %v428_v54, %v309_v51 }
 0x2c4   :  { %v430_v56 = vpop.f32.mrf.mxu0 }
 0x2c5   :  { %v433_v57 = vmul.f32 0.5, %v429_v55  ;;  %816 = vst [vmem:[%s1394_s3 + $0x10] sm:$0xff] %v429_v55 }
 0x2c6   :  { %v431_v58 = vpop.f32.mrf.mxu0 }
 0x2c7   :  { %v434_v59 = vmul.f32 1.442695, %v433_v57 }
 0x2c9   :  { %1095 = vpow2.f32 %v434_v59 }
 0x2d6   :  { %v1096_v61 = vpop.eup %1095 }
 0x2d7   :  { %v436_v62 = vmul.f32 %v1096_v61, %v16_v60 }
 0x2d9   :  { %v437_v63 = vadd.f32 %v436_v62, %v427_v53 }
 0x2db   :  { %v454_v1 = vpack.c.bf16 %v437_v63, %v437_v63 }
 0x2dd   :  { %981 = vmatmul.mubr.bf16.vlgmr.msra.gmra.mxu1 %v454_v1 }
 0x2de   :  { %1020 = vmatprep.mubr.msk.bf16.mxu1 %vm1106_vm0, %v1105_v0  ;;  %1005 = vmatpush3.bf16.msra.mxu1 %v1083_v42 }
 0x2df   :  { %1006 = vmatprep.subr.bf16.mxu1 %v1105_v0 }
 0x2e2   :  { %1007 = vmatpush3.bf16.msra.mxu1 %v1084_v43 }
 0x2e3   :  { %1008 = vmatprep.subr.bf16.mxu1 %v1105_v0 }
 0x2e6   :  { %1009 = vmatpush3.bf16.msra.mxu1 %v1085_v44 }
 0x2e7   :  { %1010 = vmatprep.subr.bf16.mxu1 %v1105_v0 }
 0x2ea   :  { %1011 = vmatpush3.bf16.msra.mxu1 %v1086_v45 }
 0x2eb   :  { %1012 = vmatprep.subr.bf16.mxu1 %v1105_v0 }
 0x2ee   :  { %1013 = vmatpush3.bf16.msra.mxu1 %v1087_v46 }
 0x2ef   :  { %1014 = vmatprep.subr.bf16.mxu1 %v1105_v0 }
 0x2f2   :  { %1015 = vmatpush3.bf16.msra.mxu1 %v1088_v47 }
 0x2f3   :  { %1016 = vmatprep.subr.bf16.mxu1 %v1105_v0 }
 0x2f6   :  { %1017 = vmatpush3.bf16.msra.mxu1 %v1089_v48 }
 0x2f7   :  { %1018 = vmatprep.subr.bf16.mxu1 %v1105_v0 }
 0x2fa   :  { %1019 = vmatpush3.bf16.msra.mxu1 %v1090_v49 }
 0x39d   :  { %v537_v10 = vpop.f32.mrf.mxu1 }
 0x39e   :  { %v545_v11 = vrot.slane %v537_v10, 4  ;;  %v552_v12 = vmul.f32 %v537_v10, %v537_v10 }
 0x39f   :  { %v982_v13 = vpop.f32.mrf.mxu1 }
 0x3a0   :  { %v546_v14 = vadd.f32 %v545_v11, %v537_v10  ;;  %v553_v15 = vrot.slane %v552_v12, 4  ;;  %v676_v11 = vld [vmem:[%s1393_s2 + $0x10] ss:$0 sm:$0xff] }
 0x3a1   :  { %v540_v16 = vpop.f32.mrf.mxu1 }
 0x3a2   :  { %v547_v17 = vrot.slane %v546_v14, 2  ;;  %v554_v18 = vadd.f32 %v553_v15, %v552_v12 }
 0x3a3   :  { %v983_v19 = vpop.f32.mrf.mxu1 }
 0x3a4   :  { %v548_v20 = vadd.f32 %v547_v17, %v546_v14  ;;  %v555_v21 = vrot.slane %v554_v18, 2 }
 0x3a6   :  { %v549_v22 = vrot.slane %v548_v20, 1  ;;  %v556_v23 = vadd.f32 %v555_v21, %v554_v18  ;;  %v719_v18 = vld [vmem:[%s1393_s2 + $0x11] ss:$0 sm:$0xff] }
 0x3a8   :  { %v550_v24 = vadd.f32 %v549_v22, %v548_v20  ;;  %v557_v25 = vrot.slane %v556_v23, 1 }
 0x3aa   :  { %v551_v26 = vmul.f32 0.125, %v550_v24  ;;  %v558_v27 = vadd.f32 %v557_v25, %v556_v23 }
 0x3ac   :  { %v559_v28 = vmul.f32 0.125, %v558_v27  ;;  %v560_v29 = vmul.f32 %v551_v26, %v551_v26 }
 0x3ae   :  { %v561_v30 = vsub.f32 %v559_v28, %v560_v29 }
 0x3b0   :  { %v562_v31 = vadd.f32 1e-05, %v561_v30 }
 0x3b2   :  { %1097 = vrsqrt.f32 %v562_v31 }
 0x3bf   :  { %v1098_v33 = vpop.eup %1097 }
 0x3c0   :  { %v564_v34 = vmul.f32 %v1098_v33, %v543_v32 }
 0x3c2   :  { %v565_v36 = vmul.f32 %v564_v34, %v551_v26  ;;  %v567_v38 = vmul.f32 %v564_v34, %v537_v10 }
 0x3c4   :  { %v566_v37 = vsub.f32 %v544_v35, %v565_v36 }
 0x3c6   :  { %v568_v39 = vadd.f32 %v567_v38, %v566_v37 }
 0x3c8   :  { %v569_v40 = vmax.f32 %v568_v39, 0.0 }
 0x3ca   :  { %v586_v41 = vpack.c.bf16 %v569_v40, %v569_v40 }
 0x3cc   :  { %1001 = vmatmul.mubr.bf16.vlgmr.msra.gmra.mxu0 %v586_v41 }
 0x48c   :  { %v669_v50 = vpop.f32.mrf.mxu0 }
 0x48d   :  { %v677_v51 = vrot.slane %v669_v50, 4  ;;  %v684_v52 = vmul.f32 %v669_v50, %v669_v50 }
 0x48e   :  { %v1002_v53 = vpop.f32.mrf.mxu0 }
 0x48f   :  { %v678_v54 = vadd.f32 %v677_v51, %v669_v50  ;;  %v685_v55 = vrot.slane %v684_v52, 4 }
 0x490   :  { %v672_v56 = vpop.f32.mrf.mxu0 }
 0x491   :  { %v679_v57 = vrot.slane %v678_v54, 2  ;;  %v686_v58 = vadd.f32 %v685_v55, %v684_v52 }
 0x492   :  { %v1003_v59 = vpop.f32.mrf.mxu0 }
 0x493   :  { %v680_v60 = vadd.f32 %v679_v57, %v678_v54  ;;  %v687_v61 = vrot.slane %v686_v58, 2 }
 0x495   :  { %v681_v62 = vrot.slane %v680_v60, 1  ;;  %v688_v63 = vadd.f32 %v687_v61, %v686_v58 }
 0x497   :  { %v682_v0 = vadd.f32 %v681_v62, %v680_v60  ;;  %v689_v1 = vrot.slane %v688_v63, 1 }
 0x499   :  { %v683_v2 = vmul.f32 0.125, %v682_v0  ;;  %v690_v3 = vadd.f32 %v689_v1, %v688_v63 }
 0x49b   :  { %v691_v4 = vmul.f32 0.125, %v690_v3  ;;  %v692_v5 = vmul.f32 %v683_v2, %v683_v2 }
 0x49d   :  { %v693_v6 = vsub.f32 %v691_v4, %v692_v5 }
 0x49f   :  { %v694_v7 = vadd.f32 1e-05, %v693_v6 }
 0x4a1   :  { %1099 = vrsqrt.f32 %v694_v7 }
 0x4ae   :  { %v1100_v9 = vpop.eup %1099 }
 0x4af   :  { %v696_v10 = vmul.f32 %v1100_v9, %v675_v8 }
 0x4b1   :  { %v697_v12 = vmul.f32 %v696_v10, %v683_v2  ;;  %v699_v14 = vmul.f32 %v696_v10, %v669_v50 }
 0x4b3   :  { %v698_v13 = vsub.f32 %v676_v11, %v697_v12 }
 0x4b5   :  { %v700_v15 = vadd.f32 %v699_v14, %v698_v13 }
 0x4b7   :  { %v701_v16 = vmax.f32 %v700_v15, 0.0 }
 0x4b9   :  { %v718_v17 = vpack.c.bf16 %v701_v16, %v701_v16 }
 0x4bb   :  { %1021 = vmatmul.mubr.bf16.vlgmr.msra.gmra.mxu1 %v718_v17 }
 0x57b   :  { %v802_v19 = vpop.f32.mrf.mxu1 }
 0x57c   :  { %v803_v20 = vadd.f32 %v802_v19, %v719_v18 }
 0x57d   :  { %v1022_v21 = vpop.f32.mrf.mxu1 }
 0x57e   :  { %v878_v22 = vmul.f32 -1.442695, %v803_v20 }
 0x57f   :  { %v805_v23 = vpop.f32.mrf.mxu1 }
 0x580   :  { %1101 = vpow2.f32 %v878_v22 }
 0x581   :  { %v1023_v24 = vpop.f32.mrf.mxu1 }
 0x58d   :  { %v1102_v25 = vpop.eup %1101 }
 0x58e   :  { %v811_v26 = vadd.f32 1.0, %v1102_v25 }
 0x590   :  { %1103 = vrcp.f32 %v811_v26 }
 0x59d   :  { %v1104_v27 = vpop.eup %1103 }
 0x59e   :  { %814 = vst [vmem:[%s1394_s3] sm:$0xff] %v1104_v27 }

</bundles_post_ra>
